<compile_context>
chip_gen: v6e
topology: v6e:2x2x1
jax: 0.10.0
libtpu: 0.0.40
codegen_flags: <defaults>
</compile_context>

<pallas_src>
import numpy as np
import jax
import jax.numpy as jnp
from jax.experimental import pallas as pl
from jax.experimental.pallas import tpu as pltpu


def ensemble_processor_kernel(
    x_ref,      # (TB*M, F)  ensemble members for this batch tile (b-major, m-minor rows)
    cond_ref,   # (TB, C)    conditions for this batch tile
    w1a_ref,    # (F, H)     encoder layer 1 weight, ensemble part
    w1b_ref,    # (C, H)     encoder layer 1 weight, conditions part
    b1_ref,     # (1, H)     encoder layer 1 bias
    w2_ref,     # (H, H)     encoder layer 2 weight
    b2_ref,     # (1, H)     encoder layer 2 bias
    v1a_ref,    # (H, H2)    decoder layer 1 weight, ensemble-code part
    v1b_ref,    # (C, H2)    decoder layer 1 weight, conditions part
    c1_ref,     # (1, H2)    decoder layer 1 bias
    v2t_ref,    # (1, H2)    decoder layer 2 weight, transposed
    c2_ref,     # (1,)       decoder layer 2 bias (scalar, SMEM)
    o_ref,      # (TB, 1)    output tile
):
    TBM = x_ref.shape[0]
    TB = cond_ref.shape[0]
    M = TBM // TB
    H = w2_ref.shape[1]

    x = x_ref[...]            # (TB*M, F)
    cond = cond_ref[...]      # (TB, C)

    # --- encoder layer 1: folded input concat -> split-weight matmuls ---
    h = jnp.dot(x, w1a_ref[...], preferred_element_type=jnp.float32) + b1_ref[...]   # (TB*M, H)
    ch = jnp.dot(cond, w1b_ref[...], preferred_element_type=jnp.float32)             # (TB, H)
    h3 = h.reshape(TB, M, H) + ch[:, None, :]       # broadcast conditions over members
    h3 = jnp.maximum(h3, 0.0)

    # --- encoder layer 2 ---
    code = (jnp.dot(h3.reshape(TBM, H), w2_ref[...], preferred_element_type=jnp.float32)
            + b2_ref[...])                                                            # (TB*M, H)

    # --- MeanMerger(keepdim=False): sublane reduction over the member axis ---
    merged = jnp.mean(code.reshape(TB, M, H), axis=1)                                 # (TB, H)

    # --- decoder with conditions at bottleneck (concat folded into split-weight matmuls) ---
    z = (jnp.dot(merged, v1a_ref[...], preferred_element_type=jnp.float32)
         + jnp.dot(cond, v1b_ref[...], preferred_element_type=jnp.float32)
         + c1_ref[...])                                                               # (TB, H2)
    z = jnp.maximum(z, 0.0)

    # --- final 1-wide layer: VPU multiply + cross-lane sum (no N=1 MXU matmul) ---
    out = jnp.sum(z * v2t_ref[...], axis=-1, keepdims=True) + c2_ref[0]               # (TB, 1)
    o_ref[...] = out.astype(o_ref.dtype)


def _replicated_spec(arr):
    nd = arr.ndim
    return pl.BlockSpec(arr.shape, lambda i, _nd=nd: (0,) * _nd)


def ensemble_processor(ensemble, conditions, params, *, tb=None):
    """ensemble: (B, M, F) f32; conditions: (B, C) f32 -> (B, 1) f32."""
    B, M, F = ensemble.shape
    C = conditions.shape[-1]
    (w1, b1, w2, b2, v1, c1, v2, c2) = params
    H = w2.shape[1]
    H2 = v1.shape[1]

    if tb is None:
        tb = B
    assert B % tb == 0, "batch tile must divide batch"

    # glue: flatten members, split the concat weights, transpose the 1-wide output weight
    x_flat = ensemble.reshape(B * M, F)
    w1a, w1b = w1[:F, :], w1[F:, :]
    v1a, v1b = v1[:H, :], v1[H:, :]
    v2t = v2.reshape(1, H2)          # (H2, 1) -> (1, H2)
    c2_s = c2.reshape((1,))          # scalar bias -> SMEM

    weights = (w1a, w1b, b1, w2, b2, v1a, v1b, c1, v2t)

    in_specs = (
        [pl.BlockSpec((tb * M, F), lambda i: (i, 0)),
         pl.BlockSpec((tb, C), lambda i: (i, 0))]
        + [_replicated_spec(w) for w in weights]
        + [pl.BlockSpec(memory_space=pltpu.MemorySpace.SMEM)]
    )

    grid_spec = pl.GridSpec(
        grid=(B // tb,),
        in_specs=in_specs,
        out_specs=pl.BlockSpec((tb, 1), lambda i: (i, 0)),
    )

    return pl.pallas_call(
        ensemble_processor_kernel,
        out_shape=jax.ShapeDtypeStruct((B, 1), jnp.float32),
        grid_spec=grid_spec,
        compiler_params=pltpu.CompilerParams(
            dimension_semantics=("parallel",)),
    )(x_flat, conditions, *weights, c2_s)


def reference(ensemble, conditions, params):
    """Pure-JAX reference mirroring the PyTorch forward semantics."""
    (w1, b1, w2, b2, v1, c1, v2, c2) = params
    B, M, F = ensemble.shape
    C = conditions.shape[-1]
    cond_tiled = jnp.broadcast_to(conditions[:, None, :], (B, M, C))
    pred = jnp.concatenate([ensemble, cond_tiled], axis=-1)          # _combine_inputs (input)
    h = jnp.maximum(pred @ w1 + b1, 0.0)                             # encoder
    member_code = h @ w2 + b2
    ensemble_code = member_code.mean(axis=-2)                        # MeanMerger(keepdim=False)
    z = jnp.concatenate([ensemble_code, conditions], axis=-1)        # _combine_inputs (bottleneck)
    z = jnp.maximum(z @ v1 + c1, 0.0)                                # decoder
    return z @ v2 + c2


def make_params(key, F, C, H, H2):
    ks = jax.random.split(key, 8)
    def init(k, shape, fan_in):
        return (jax.random.normal(k, shape, jnp.float32) / np.sqrt(fan_in)).astype(jnp.float32)
    w1 = init(ks[0], (F + C, H), F + C)
    b1 = init(ks[1], (1, H), H)
    w2 = init(ks[2], (H, H), H)
    b2 = init(ks[3], (1, H), H)
    v1 = init(ks[4], (H + C, H2), H + C)
    c1 = init(ks[5], (1, H2), H2)
    v2 = init(ks[6], (H2, 1), H2)
    c2 = init(ks[7], (1, 1), 1)
    return (w1, b1, w2, b2, v1, c1, v2, c2)


if __name__ == "__main__":
    # small shapes; TB*M and TB chosen (8,128)-tile friendly so the batch grid pipelines cleanly
    B, M, F, C, H, H2 = 16, 8, 32, 8, 32, 32
    TB = 8                                   # grid = (2,), batch axis "parallel"

    key = jax.random.PRNGKey(0)
    k_ens, k_cond, k_par = jax.random.split(key, 3)
    ensemble = jax.random.normal(k_ens, (B, M, F), jnp.float32)
    conditions = jax.random.normal(k_cond, (B, C), jnp.float32)
    params = make_params(k_par, F, C, H, H2)

    out = ensemble_processor(ensemble, conditions, params, tb=TB)
    out = jax.block_until_ready(out)

    ref = jax.block_until_ready(reference(ensemble, conditions, params))
    np.testing.assert_allclose(np.asarray(out), np.asarray(ref), rtol=1e-5, atol=1e-5)

    print("KERNEL_OK")
</pallas_src>

<mosaic_0001>
module attributes {stable_mosaic.version = 11 : i64} {
  func.func @ensemble_processor_kernel(%arg0: i32, %arg1: memref<64x32xf32, #tpu.memory_space<vmem>>, %arg2: memref<8x8xf32, #tpu.memory_space<vmem>>, %arg3: memref<32x32xf32, #tpu.memory_space<vmem>>, %arg4: memref<8x32xf32, #tpu.memory_space<vmem>>, %arg5: memref<1x32xf32, #tpu.memory_space<vmem>>, %arg6: memref<32x32xf32, #tpu.memory_space<vmem>>, %arg7: memref<1x32xf32, #tpu.memory_space<vmem>>, %arg8: memref<32x32xf32, #tpu.memory_space<vmem>>, %arg9: memref<8x32xf32, #tpu.memory_space<vmem>>, %arg10: memref<1x32xf32, #tpu.memory_space<vmem>>, %arg11: memref<1x32xf32, #tpu.memory_space<vmem>>, %arg12: memref<1xf32, #tpu.memory_space<smem>>, %arg13: memref<8x1xf32, #tpu.memory_space<vmem>>) attributes {dimension_semantics = [#tpu.dimension_semantics<parallel>], iteration_bounds = array<i64: 2>, scalar_prefetch = 0 : i64, scratch_operands = 0 : i64, tpu.core_type = #tpu.core_type<tc>, window_params = [{transform_indices = @transform_0, window_bounds = array<i64: 64, 32>}, {transform_indices = @transform_1, window_bounds = array<i64: 8, 8>}, {pipeline_mode = #tpu.pipeline_mode<synchronous>, transform_indices = @transform_2, window_bounds = array<i64: 32, 32>}, {pipeline_mode = #tpu.pipeline_mode<synchronous>, transform_indices = @transform_3, window_bounds = array<i64: 8, 32>}, {pipeline_mode = #tpu.pipeline_mode<synchronous>, transform_indices = @transform_4, window_bounds = array<i64: 1, 32>}, {pipeline_mode = #tpu.pipeline_mode<synchronous>, transform_indices = @transform_5, window_bounds = array<i64: 32, 32>}, {pipeline_mode = #tpu.pipeline_mode<synchronous>, transform_indices = @transform_6, window_bounds = array<i64: 1, 32>}, {pipeline_mode = #tpu.pipeline_mode<synchronous>, transform_indices = @transform_7, window_bounds = array<i64: 32, 32>}, {pipeline_mode = #tpu.pipeline_mode<synchronous>, transform_indices = @transform_8, window_bounds = array<i64: 8, 32>}, {pipeline_mode = #tpu.pipeline_mode<synchronous>, transform_indices = @transform_9, window_bounds = array<i64: 1, 32>}, {pipeline_mode = #tpu.pipeline_mode<synchronous>, transform_indices = @transform_10, window_bounds = array<i64: 1, 32>}, {transform_indices = @transform_11, window_bounds = array<i64: 1>}, {transform_indices = @transform_12, window_bounds = array<i64: 8, 1>}]} {
    %c0 = arith.constant 0 : index
    %c0_0 = arith.constant 0 : index
    %0 = vector.load %arg1[%c0, %c0_0] : memref<64x32xf32, #tpu.memory_space<vmem>>, vector<64x32xf32>
    %c0_1 = arith.constant 0 : index
    %c0_2 = arith.constant 0 : index
    %1 = vector.load %arg2[%c0_1, %c0_2] : memref<8x8xf32, #tpu.memory_space<vmem>>, vector<8x8xf32>
    %c0_3 = arith.constant 0 : index
    %c0_4 = arith.constant 0 : index
    %2 = vector.load %arg3[%c0_3, %c0_4] : memref<32x32xf32, #tpu.memory_space<vmem>>, vector<32x32xf32>
    %cst = arith.constant dense<0.000000e+00> : vector<64x32xf32>
    %3 = tpu.matmul %0, %2, %cst {dimension_numbers = #tpu.dot_dimension_numbers<[1], [0], [0], [1], [0, 0, 1, 1], [], []>} : vector<64x32xf32>, vector<32x32xf32>, vector<64x32xf32> -> vector<64x32xf32>
    %c0_5 = arith.constant 0 : index
    %c0_6 = arith.constant 0 : index
    %4 = vector.load %arg5[%c0_5, %c0_6] : memref<1x32xf32, #tpu.memory_space<vmem>>, vector<1x32xf32>
    %5 = vector.broadcast %4 : vector<1x32xf32> to vector<64x32xf32>
    %6 = arith.addf %3, %5 : vector<64x32xf32>
    %c0_7 = arith.constant 0 : index
    %c0_8 = arith.constant 0 : index
    %7 = vector.load %arg4[%c0_7, %c0_8] : memref<8x32xf32, #tpu.memory_space<vmem>>, vector<8x32xf32>
    %cst_9 = arith.constant dense<0.000000e+00> : vector<8x32xf32>
    %8 = tpu.matmul %1, %7, %cst_9 {dimension_numbers = #tpu.dot_dimension_numbers<[1], [0], [0], [1], [0, 0, 1, 1], [], []>} : vector<8x8xf32>, vector<8x32xf32>, vector<8x32xf32> -> vector<8x32xf32>
    %9 = vector.shape_cast %6 : vector<64x32xf32> to vector<8x8x32xf32>
    %10 = vector.shape_cast %8 : vector<8x32xf32> to vector<8x1x32xf32>
    %11 = vector.broadcast %10 : vector<8x1x32xf32> to vector<8x8x32xf32>
    %12 = arith.addf %9, %11 : vector<8x8x32xf32>
    %cst_10 = arith.constant 0.000000e+00 : f32
    %13 = vector.broadcast %cst_10 : f32 to vector<8x8x32xf32>
    %14 = arith.maximumf %12, %13 : vector<8x8x32xf32>
    %15 = vector.shape_cast %14 : vector<8x8x32xf32> to vector<64x32xf32>
    %c0_11 = arith.constant 0 : index
    %c0_12 = arith.constant 0 : index
    %16 = vector.load %arg6[%c0_11, %c0_12] : memref<32x32xf32, #tpu.memory_space<vmem>>, vector<32x32xf32>
    %cst_13 = arith.constant dense<0.000000e+00> : vector<64x32xf32>
    %17 = tpu.matmul %15, %16, %cst_13 {dimension_numbers = #tpu.dot_dimension_numbers<[1], [0], [0], [1], [0, 0, 1, 1], [], []>} : vector<64x32xf32>, vector<32x32xf32>, vector<64x32xf32> -> vector<64x32xf32>
    %c0_14 = arith.constant 0 : index
    %c0_15 = arith.constant 0 : index
    %18 = vector.load %arg7[%c0_14, %c0_15] : memref<1x32xf32, #tpu.memory_space<vmem>>, vector<1x32xf32>
    %19 = vector.broadcast %18 : vector<1x32xf32> to vector<64x32xf32>
    %20 = arith.addf %17, %19 : vector<64x32xf32>
    %21 = vector.shape_cast %20 : vector<64x32xf32> to vector<8x8x32xf32>
    %cst_16 = arith.constant dense<0.000000e+00> : vector<8x32xf32>
    %22 = vector.multi_reduction <add>, %21, %cst_16 [1] : vector<8x8x32xf32> to vector<8x32xf32>
    %cst_17 = arith.constant 8.000000e+00 : f32
    %23 = vector.broadcast %cst_17 : f32 to vector<8x32xf32>
    %24 = arith.divf %22, %23 : vector<8x32xf32>
    %c0_18 = arith.constant 0 : index
    %c0_19 = arith.constant 0 : index
    %25 = vector.load %arg8[%c0_18, %c0_19] : memref<32x32xf32, #tpu.memory_space<vmem>>, vector<32x32xf32>
    %cst_20 = arith.constant dense<0.000000e+00> : vector<8x32xf32>
    %26 = tpu.matmul %24, %25, %cst_20 {dimension_numbers = #tpu.dot_dimension_numbers<[1], [0], [0], [1], [0, 0, 1, 1], [], []>} : vector<8x32xf32>, vector<32x32xf32>, vector<8x32xf32> -> vector<8x32xf32>
    %c0_21 = arith.constant 0 : index
    %c0_22 = arith.constant 0 : index
    %27 = vector.load %arg9[%c0_21, %c0_22] : memref<8x32xf32, #tpu.memory_space<vmem>>, vector<8x32xf32>
    %cst_23 = arith.constant dense<0.000000e+00> : vector<8x32xf32>
    %28 = tpu.matmul %1, %27, %cst_23 {dimension_numbers = #tpu.dot_dimension_numbers<[1], [0], [0], [1], [0, 0, 1, 1], [], []>} : vector<8x8xf32>, vector<8x32xf32>, vector<8x32xf32> -> vector<8x32xf32>
    %29 = arith.addf %26, %28 : vector<8x32xf32>
    %c0_24 = arith.constant 0 : index
    %c0_25 = arith.constant 0 : index
    %30 = vector.load %arg10[%c0_24, %c0_25] : memref<1x32xf32, #tpu.memory_space<vmem>>, vector<1x32xf32>
    %31 = vector.broadcast %30 : vector<1x32xf32> to vector<8x32xf32>
    %32 = arith.addf %29, %31 : vector<8x32xf32>
    %cst_26 = arith.constant 0.000000e+00 : f32
    %33 = vector.broadcast %cst_26 : f32 to vector<8x32xf32>
    %34 = arith.maximumf %32, %33 : vector<8x32xf32>
    %c0_27 = arith.constant 0 : index
    %c0_28 = arith.constant 0 : index
    %35 = vector.load %arg11[%c0_27, %c0_28] : memref<1x32xf32, #tpu.memory_space<vmem>>, vector<1x32xf32>
    %36 = vector.broadcast %35 : vector<1x32xf32> to vector<8x32xf32>
    %37 = arith.mulf %34, %36 : vector<8x32xf32>
    %cst_29 = arith.constant dense<0.000000e+00> : vector<8xf32>
    %38 = vector.multi_reduction <add>, %37, %cst_29 [1] : vector<8x32xf32> to vector<8xf32>
    %39 = vector.shape_cast %38 : vector<8xf32> to vector<8x1xf32>
    %c0_30 = arith.constant 0 : index
    %40 = memref.load %arg12[%c0_30] : memref<1xf32, #tpu.memory_space<smem>>
    %41 = vector.broadcast %40 : f32 to vector<8x1xf32>
    %42 = arith.addf %39, %41 : vector<8x1xf32>
    %c0_31 = arith.constant 0 : index
    %c0_32 = arith.constant 0 : index
    %43 = vector.load %arg13[%c0_31, %c0_32] : memref<8x1xf32, #tpu.memory_space<vmem>>, vector<8x1xf32>
    tpu.vector_store %arg13[%c0_31, %c0_32], %42 {strides = array<i32>} : memref<8x1xf32, #tpu.memory_space<vmem>>, vector<8x1xf32>,
    return
  }
  func.func @transform_0(%arg0: i32) -> (i32, i32) {
    %c0_i32 = arith.constant 0 : i32
    %c0_i32_0 = arith.constant 0 : i32
    return %arg0, %c0_i32 : i32, i32
  }
  func.func @transform_1(%arg0: i32) -> (i32, i32) {
    %c0_i32 = arith.constant 0 : i32
    %c0_i32_0 = arith.constant 0 : i32
    return %arg0, %c0_i32 : i32, i32
  }
  func.func @transform_2(%arg0: i32) -> (i32, i32) {
    %c0_i32 = arith.constant 0 : i32
    %c0_i32_0 = arith.constant 0 : i32
    %c0_i32_1 = arith.constant 0 : i32
    return %c0_i32, %c0_i32_0 : i32, i32
  }
  func.func @transform_3(%arg0: i32) -> (i32, i32) {
    %c0_i32 = arith.constant 0 : i32
    %c0_i32_0 = arith.constant 0 : i32
    %c0_i32_1 = arith.constant 0 : i32
    return %c0_i32, %c0_i32_0 : i32, i32
  }
  func.func @transform_4(%arg0: i32) -> (i32, i32) {
    %c0_i32 = arith.constant 0 : i32
    %c0_i32_0 = arith.constant 0 : i32
    %c0_i32_1 = arith.constant 0 : i32
    return %c0_i32, %c0_i32_0 : i32, i32
  }
  func.func @transform_5(%arg0: i32) -> (i32, i32) {
    %c0_i32 = arith.constant 0 : i32
    %c0_i32_0 = arith.constant 0 : i32
    %c0_i32_1 = arith.constant 0 : i32
    return %c0_i32, %c0_i32_0 : i32, i32
  }
  func.func @transform_6(%arg0: i32) -> (i32, i32) {
    %c0_i32 = arith.constant 0 : i32
    %c0_i32_0 = arith.constant 0 : i32
    %c0_i32_1 = arith.constant 0 : i32
    return %c0_i32, %c0_i32_0 : i32, i32
  }
  func.func @transform_7(%arg0: i32) -> (i32, i32) {
    %c0_i32 = arith.constant 0 : i32
    %c0_i32_0 = arith.constant 0 : i32
    %c0_i32_1 = arith.constant 0 : i32
    return %c0_i32, %c0_i32_0 : i32, i32
  }
  func.func @transform_8(%arg0: i32) -> (i32, i32) {
    %c0_i32 = arith.constant 0 : i32
    %c0_i32_0 = arith.constant 0 : i32
    %c0_i32_1 = arith.constant 0 : i32
    return %c0_i32, %c0_i32_0 : i32, i32
  }
  func.func @transform_9(%arg0: i32) -> (i32, i32) {
    %c0_i32 = arith.constant 0 : i32
    %c0_i32_0 = arith.constant 0 : i32
    %c0_i32_1 = arith.constant 0 : i32
    return %c0_i32, %c0_i32_0 : i32, i32
  }
  func.func @transform_10(%arg0: i32) -> (i32, i32) {
    %c0_i32 = arith.constant 0 : i32
    %c0_i32_0 = arith.constant 0 : i32
    %c0_i32_1 = arith.constant 0 : i32
    return %c0_i32, %c0_i32_0 : i32, i32
  }
  func.func @transform_11(%arg0: i32) -> i32 {
    %c0_i32 = arith.constant 0 : i32
    %c0_i32_0 = arith.constant 0 : i32
    return %c0_i32 : i32
  }
  func.func @transform_12(%arg0: i32) -> (i32, i32) {
    %c0_i32 = arith.constant 0 : i32
    %c0_i32_0 = arith.constant 0 : i32
    return %arg0, %c0_i32 : i32, i32
  }
}

</mosaic_0001>

<bundles_post_ra>
// kernel: tpu_custom_call.1
= control target key start
LH: loop header
LB: loop body
LE: loop exit
PB: predicated region body
PF: predicated region fallthrough
CT: control target
= control target key end

     0   :  { %s1445_s23 = smov 0   ;;  %s1575_s0 = inlined_call_operand.vmem [shape: f32[128,32], index: 0, kind: input, shape index: {}]   ;;  %s1576_s1 = inlined_call_operand.vmem [shape: f32[16,8], index: 1, kind: input, shape index: {}]   ;;  %s1577_s2 = inlined_call_operand.vmem [shape: f32[32,32], index: 2, kind: input, shape index: {}]   ;;  %s1578_s3 = inlined_call_operand.vmem [shape: f32[8,32], index: 3, kind: input, shape index: {}]   ;;  %s1579_s4 = inlined_call_operand.vmem [shape: f32[1,32], index: 4, kind: input, shape index: {}]   ;;  %s1580_s5 = inlined_call_operand.vmem [shape: f32[32,32], index: 5, kind: input, shape index: {}]   ;;  %s1581_s6 = inlined_call_operand.vmem [shape: f32[1,32], index: 6, kind: input, shape index: {}]   ;;  %s1582_s7 = inlined_call_operand.vmem [shape: f32[32,32], index: 7, kind: input, shape index: {}]   ;;  %s1583_s8 = inlined_call_operand.vmem [shape: f32[8,32], index: 8, kind: input, shape index: {}]   ;;  %s1584_s9 = inlined_call_operand.vmem [shape: f32[1,32], index: 9, kind: input, shape index: {}]   ;;  %s1585_s10 = inlined_call_operand.vmem [shape: f32[1,32], index: 10, kind: input, shape index: {}]   ;;  %s1586_s11 = inlined_call_operand.<no memory space> [shape: f32[1], index: 11, kind: input, shape index: {}]   ;;  %s1587_s12 = inlined_call_operand.vmem [shape: f32[16,1], index: 12, kind: output, shape index: {}]  }
   0x1   :  { %17 = sst [smem:[#allocation2]] %s1586_s11 }
   0x2 LB: > { %s1451_s24 = sadd.s32 4294967295, %s1372_s23   ;;  %p1231_p0 = scmp.ge.s32.totalorder %s1372_s23, 1  ;;  %s1372_s23 = sphi %s1445_s23, %s23_s23  }
   0x3   : > { %p373_p1 = scmp.lt.s32.totalorder %s1372_s23, 3 }
   0x5   : > { %p374_p2 = pnand %p1231_p0, %p373_p1 }
   0x6   : > { %p424_p3 = scmp.lt.s32.totalorder (!%p374_p2), %s1451_s24, 1  ;;  %s1232_s30 = sshll.u32 (!%p374_p2), %s1451_s24, 3 }
   0x7   : > { %377 = sbr.rel (%p374_p2) target bundleno = 792 (0x318), region = 68  ;;  %p419_p4 = scmp.lt.s32.totalorder (!%p374_p2), %s1232_s30, 15 }
   0x8   : > { %s1157_s19 = sld [smem:[#allocation2]] (!%p374_p2) }
   0xc   : > { %v444_v0 = vld [vmem:[%s1577_s2 + $0x18] sm:$0xff]  ;;  %v443_v1 = vld [vmem:[%s1577_s2 + $0x10] sm:$0xff]  ;;  %v1374_v2 = vmov 0.0   ;;  %v582_v3 = vld [vmem:[%s1578_s3] sm:$0xff]  ;;  %s1589_s24 = smov (!%p424_p3, %s1451_s24), 1  ;;  %vm1375_vm0 = vmmov 0   ;;  %v662_v21 = vlaneseq }
   0xd   : > { %1294 = vmatprep.subr.mxu0 %v444_v0  ;;  %1314 = vmatprep.subr.mxu1 %v1374_v2  ;;  %v442_v4 = vld [vmem:[%s1577_s2 + $0x8] sm:$0xff]  ;;  %v441_v5 = vld [vmem:[%s1577_s2] sm:$0xff]  ;;  %s1234_s17 = sshll.u32 %s1589_s24, 3  ;;  %vm583_vm1 = vcmask 64512   ;;  %s1591_s30 = smov (!%p419_p4, %s1232_s30), 15  ;;  %vm452_vm2 = vcmask 261120  }
   0xe   : > { %1295 = vmatpush3.msra.mxu0 %v444_v0  ;;  %1315 = vmatpush3.msra.mxu1 %v582_v3  ;;  %s427_s20 = scalar_lea.vmem %s1576_s1, %s1234_s17  ;;  %s1233_s21 = sshll.u32 %s1591_s30, 3  ;;  %v766_v15 = vld [vmem:[%s1580_s5 + $0x18] sm:$0xff]  ;;  %v765_v16 = vld [vmem:[%s1580_s5 + $0x10] sm:$0xff]  ;;  %v764_v17 = vld [vmem:[%s1580_s5 + $0x8] sm:$0xff]  ;;  %v1376_v19 = vmov 1966171168  }
   0xf   : > { %1296 = vmatprep.subr.mxu0 %v443_v1  ;;  %1316 = vmatprep.mubr.msk.f32.mxu1 %vm1375_vm0, %v1374_v2  ;;  %v1484_v6 = vld [vmem:[%s427_s20] sm:$0xff]  ;;  %s422_s26 = scalar_lea.vmem %s1575_s0, %s1233_s21  ;;  %v660_v20 = vunpack.c.l.s4 %v1376_v19  ;;  %v663_v23 = vshrl.u32 %v662_v21, 7  ;;  %v970_v21 = vld [vmem:[%s1582_s7 + $0x10] sm:$0xff]  ;;  %vm1051_vm3 = vcmask 1041409   ;;  %vm1053_vm4 = vcmask 1042434   ;;  %s431_s22 = scalar_lea.vmem %s1587_s12, %s1234_s17 }
  0x10   : > { %1297 = vmatpush3.msra.mxu0 %v443_v1  ;;  %1317 = vmatmul.mubr.msk.f32.vlgmr.msra.gmra.mxu1 %vm583_vm1, %v1484_v6  ;;  %v432_v7 = vld [vmem:[%s422_s26] sm:$0xff]  ;;  %v433_v8 = vld [vmem:[%s422_s26 + $0x8] sm:$0xff]  ;;  %v434_v9 = vld [vmem:[%s422_s26 + $0x10] sm:$0xff]  ;;  %vm1055_vm5 = vcmask 1043459   ;;  %vm1057_vm6 = vcmask 1044484   ;;  %vm1059_vm7 = vcmask 1045509  }
  0x11   : > { %1298 = vmatprep.subr.mxu0 %v442_v4  ;;  %1302 = vmatprep.mubr.msk.f32.mxu0 %vm452_vm2, %v432_v7  ;;  %v435_v10 = vld [vmem:[%s422_s26 + $0x18] sm:$0xff]  ;;  %v436_v11 = vld [vmem:[%s422_s26 + $0x20] sm:$0xff]  ;;  %v437_v12 = vld [vmem:[%s422_s26 + $0x28] sm:$0xff]  ;;  %v661_v22 = vunpack.c.0.s8 %v660_v20  ;;  %v709_v28 = vsub.s32 0, %v663_v23  ;;  %vm1061_vm8 = vcmask 1046534   ;;  %vm1063_vm9 = vcmask 1047559  }
  0x12   : > { %1299 = vmatpush3.msra.mxu0 %v442_v4  ;;  %v438_v13 = vld [vmem:[%s422_s26 + $0x30] sm:$0xff]  ;;  %v439_v14 = vld [vmem:[%s422_s26 + $0x38] sm:$0xff]  ;;  %1319 = vmatprep.subr.mxu1 %v766_v15  ;;  %v763_v18 = vld [vmem:[%s1580_s5] sm:$0xff]  ;;  %vm1160_vm10 = vcmask 7168  }
  0x13   : > { %1300 = vmatprep.subr.mxu0 %v441_v5  ;;  %1320 = vmatpush3.msra.mxu1 %v766_v15  ;;  %v664_v24 = vsub.s32 %v661_v22, %v663_v23  ;;  %v1236_v33 = vld [vmem:[%s1579_s4] ss:$0 sm:$0xff]  ;;  %v971_v20 = vld [vmem:[%s1582_s7 + $0x18] sm:$0xff]  ;;  %v969_v23 = vld [vmem:[%s1582_s7 + $0x8] sm:$0xff] }
  0x14   : > { %1301 = vmatpush3.msra.mxu0 %v441_v5  ;;  %1321 = vmatprep.subr.mxu1 %v765_v16  ;;  %v972_v22 = vld [vmem:[%s1583_s8] sm:$0xff] }
  0x15   : > { %1339 = vmatprep.subr.mxu0 %v1374_v2  ;;  %1303 = vmatmul.mubr.msk.f32.vlgmr.msra.gmra.mxu0 %vm452_vm2, %v433_v8 }
  0x16   : > { %1305 = vmatprep.mubr.msk.f32.mxu0 %vm452_vm2, %v434_v9  ;;  %1322 = vmatpush3.msra.mxu1 %v765_v16 }
  0x17   : > { %1323 = vmatprep.subr.mxu1 %v764_v17  ;;  %1340 = vmatpush3.msra.mxu0 %v972_v22 }
  0x18   : > { %1324 = vmatpush3.msra.mxu1 %v764_v17 }
  0x19   : > { %1306 = vmatmul.mubr.msk.f32.gmra.mxu0 %vm452_vm2, %v435_v10  ;;  %1325 = vmatprep.subr.mxu1 %v763_v18 }
  0x1a   : > { %1308 = vmatprep.mubr.msk.f32.mxu0 %vm452_vm2, %v436_v11  ;;  %1326 = vmatpush3.msra.mxu1 %v763_v18 }
  0x1b   : > { %1344 = vmatprep.subr.mxu1 %v1374_v2 }
  0x1d   : > { %1309 = vmatmul.mubr.msk.f32.gmra.mxu0 %vm452_vm2, %v437_v12 }
  0x1e   : > { %1311 = vmatprep.mubr.msk.f32.mxu0 %vm452_vm2, %v438_v13 }
  0x21   : > { %1312 = vmatmul.mubr.msk.f32.gmra.mxu0 %vm452_vm2, %v439_v14 }
  0x22   : > { %1341 = vmatprep.mubr.msk.f32.mxu0 %vm1375_vm0, %v1374_v2 }
  0x25   : > { %1342 = vmatmul.mubr.msk.f32.vlgmr.msra.gmra.mxu0 %vm583_vm1, %v1484_v6 }
  0xd0   : > { %v653_v25 = vpop.f32.mrf.mxu1 }
  0xd1   : > { %v658_v26 = vcombine.high %v653_v25, %v653_v25  ;;  %v665_v27 = vrot.slane %v653_v25, %v664_v24  ;;  %v1246_v25 = vld [vmem:[%s1581_s6] ss:$0 sm:$0xff] }
  0xd2   : > { %v1318_v29 = vpop.f32.mrf.mxu1 }
  0xd3   : > { %v672_v30 = vrot.slane %v658_v26, %v664_v24  ;;  %v673_v31 = vcombine.high %v665_v27, %v665_v27  ;;  %v681_v32 = vrot.slane %v665_v27, %v664_v24 }
  0xd5   : > { %v695_v34 = vrot.slane %v673_v31, %v664_v24  ;;  %v1304_v35 = vpop.f32.mrf.mxu0  ;;  %v710_v36 = vrot.slane %v681_v32, %v709_v28  ;;  %v674_v37 = vcombine.high %v672_v30, %v672_v30  ;;  %v703_v42 = vcombine.high %v681_v32, %v681_v32 }
  0xd6   : > { %v549_v38 = vadd.f32 %v1304_v35, %v1236_v33  ;;  %v688_v52 = vrot.slane %v672_v30, %v664_v24 }
  0xd7   : > { %v714_v39 = vrot.slane %v695_v34, %v709_v28  ;;  %v543_v40 = vpop.f32.mrf.mxu0  ;;  %v705_v41 = vcombine.high %v695_v34, %v695_v34  ;;  %v702_v51 = vrot.slane %v674_v37, %v664_v24  ;;  %v718_v55 = vrot.slane %v703_v42, %v709_v28  ;;  %v968_v24 = vld [vmem:[%s1582_s7] sm:$0xff] }
  0xd8   : > { %v544_v43 = vadd.f32 %v1236_v33, %v543_v40  ;;  %v726_v1 = vrot.slane %v688_v52, %v709_v28  ;;  %v704_v3 = vcombine.high %v688_v52, %v688_v52 }
  0xd9   : > { %v748_v44 = vadd.f32 %v714_v39, %v549_v38  ;;  %v1307_v45 = vpop.f32.mrf.mxu0  ;;  %v722_v46 = vrot.slane %v705_v41, %v709_v28  ;;  %v730_v60 = vrot.slane %v702_v51, %v709_v28  ;;  %v706_v62 = vcombine.high %v702_v51, %v702_v51 }
  0xda   : > { %v747_v47 = vadd.f32 %v710_v36, %v544_v43  ;;  %v559_v48 = vadd.f32 %v1307_v45, %v1236_v33  ;;  %v734_v14 = vrot.slane %v704_v3, %v709_v28 }
  0xdb   : > { %v756_v49 = vmax.f32 %v748_v44, 0.0  ;;  %v553_v50 = vpop.f32.mrf.mxu0  ;;  %v738_v10 = vrot.slane %v706_v62, %v709_v28 }
  0xdc   : > { %v755_v53 = vmax.f32 %v747_v47, 0.0  ;;  %v554_v54 = vadd.f32 %v1236_v33, %v553_v50  ;;  %v750_v56 = vadd.f32 %v722_v46, %v559_v48 }
  0xdd   : > { %v1310_v57 = vpop.f32.mrf.mxu0 }
  0xde   : > { %v749_v58 = vadd.f32 %v718_v55, %v554_v54  ;;  %v569_v59 = vadd.f32 %v1310_v57, %v1236_v33  ;;  %1327 = vmatprep.mubr.msk.f32.mxu1 %vm452_vm2, %v755_v53  ;;  %v758_v4 = vmax.f32 %v750_v56, 0.0 }
  0xdf   : > { %v563_v61 = vpop.f32.mrf.mxu0  ;;  %1328 = vmatmul.mubr.msk.f32.vlgmr.msra.gmra.mxu1 %vm452_vm2, %v756_v49 }
  0xe0   : > { %v757_v63 = vmax.f32 %v749_v58, 0.0  ;;  %v564_v0 = vadd.f32 %v1236_v33, %v563_v61  ;;  %v752_v5 = vadd.f32 %v730_v60, %v569_v59  ;;  %1345 = vmatpush3.msra.mxu1 %v971_v20 }
  0xe1   : > { %v1313_v7 = vpop.f32.mrf.mxu0  ;;  %1346 = vmatprep.subr.mxu1 %v1374_v2 }
  0xe2   : > { %v751_v8 = vadd.f32 %v726_v1, %v564_v0  ;;  %v579_v9 = vadd.f32 %v1313_v7, %v1236_v33  ;;  %1330 = vmatprep.mubr.msk.f32.mxu1 %vm452_vm2, %v757_v63  ;;  %v760_v15 = vmax.f32 %v752_v5, 0.0  ;;  %1347 = vmatpush3.msra.mxu1 %v970_v21 }
  0xe3   : > { %v573_v11 = vpop.f32.mrf.mxu0  ;;  %1331 = vmatmul.mubr.msk.f32.gmra.mxu1 %vm452_vm2, %v758_v4  ;;  %1348 = vmatprep.subr.mxu1 %v1374_v2 }
  0xe4   : > { %v759_v12 = vmax.f32 %v751_v8, 0.0  ;;  %v574_v13 = vadd.f32 %v1236_v33, %v573_v11  ;;  %v754_v16 = vadd.f32 %v738_v10, %v579_v9  ;;  %1349 = vmatpush3.msra.mxu1 %v969_v23 }
  0xe5   : > { %1350 = vmatprep.subr.mxu1 %v1374_v2 }
  0xe6   : > { %v753_v17 = vadd.f32 %v734_v14, %v574_v13  ;;  %1333 = vmatprep.mubr.msk.f32.mxu1 %vm452_vm2, %v759_v12  ;;  %v762_v19 = vmax.f32 %v754_v16, 0.0  ;;  %1351 = vmatpush3.msra.mxu1 %v968_v24 }
  0xe7   : > { %1334 = vmatmul.mubr.msk.f32.gmra.mxu1 %vm452_vm2, %v760_v15 }
  0xe8   : > { %v761_v18 = vmax.f32 %v753_v17, 0.0 }
  0xea   : > { %1336 = vmatprep.mubr.msk.f32.mxu1 %vm452_vm2, %v761_v18 }
  0xeb   : > { %1337 = vmatmul.mubr.msk.f32.gmra.mxu1 %vm452_vm2, %v762_v19 }
  0xec   : > { %1352 = vmatprep.mubr.msk.f32.mxu1 %vm1375_vm0, %v1374_v2 }
 0x19f   : > { %v1329_v26 = vpop.f32.mrf.mxu1 }
 0x1a0   : > { %v870_v27 = vadd.f32 %v1329_v26, %v1246_v25 }
 0x1a1   : > { %v864_v28 = vpop.f32.mrf.mxu1 }
 0x1a2   : > { %v910_v29 = vsel %vm452_vm2, %v870_v27, 0.0  ;;  %v865_v30 = vadd.f32 %v1246_v25, %v864_v28 }
 0x1a3   : > { %v911_v31 = vrot.slane %v910_v29, 4  ;;  %v1332_v32 = vpop.f32.mrf.mxu1 }
 0x1a4   : > { %v903_v33 = vsel %vm452_vm2, %v865_v30, 0.0  ;;  %v880_v34 = vadd.f32 %v1332_v32, %v1246_v25 }
 0x1a5   : > { %v912_v35 = vadd.f32 %v911_v31, %v910_v29  ;;  %v904_v6 = vrot.slane %v903_v33, 4  ;;  %v874_v36 = vpop.f32.mrf.mxu1 }
 0x1a6   : > { %v924_v2 = vsel %vm452_vm2, %v880_v34, 0.0  ;;  %v875_v37 = vadd.f32 %v1246_v25, %v874_v36 }
 0x1a7   : > { %v913_v38 = vrot.slane %v912_v35, 2  ;;  %v905_v39 = vadd.f32 %v904_v6, %v903_v33  ;;  %v925_v40 = vrot.slane %v924_v2, 4  ;;  %v1335_v41 = vpop.f32.mrf.mxu1 }
 0x1a8   : > { %v917_v42 = vsel %vm452_vm2, %v875_v37, 0.0  ;;  %v890_v43 = vadd.f32 %v1335_v41, %v1246_v25 }
 0x1a9   : > { %v914_v44 = vadd.f32 %v913_v38, %v912_v35  ;;  %v906_v45 = vrot.slane %v905_v39, 2  ;;  %v926_v46 = vadd.f32 %v925_v40, %v924_v2  ;;  %v918_v47 = vrot.slane %v917_v42, 4  ;;  %v884_v48 = vpop.f32.mrf.mxu1 }
 0x1aa   : > { %v938_v49 = vsel %vm452_vm2, %v890_v43, 0.0  ;;  %v885_v50 = vadd.f32 %v1246_v25, %v884_v48 }
 0x1ab   : > { %v907_v51 = vadd.f32 %v906_v45, %v905_v39  ;;  %v927_v52 = vrot.slane %v926_v46, 2  ;;  %v919_v53 = vadd.f32 %v918_v47, %v917_v42  ;;  %v1338_v54 = vpop.f32.mrf.mxu1  ;;  %v939_v55 = vrot.slane %v938_v49, 4  ;;  %v1039_v47 = vpop.f32.mrf.mxu0 }
 0x1ac   : > { %v931_v56 = vsel %vm452_vm2, %v885_v50, 0.0  ;;  %v900_v57 = vadd.f32 %v1338_v54, %v1246_v25  ;;  %v915_v58 = vrot.slane %v914_v44, 1  ;;  %v1257_v50 = vld [vmem:[%s1584_s9] ss:$0 sm:$0xff] }
 0x1ad   : > { %v908_v59 = vrot.slane %v907_v51, 1  ;;  %v928_v60 = vadd.f32 %v927_v52, %v926_v46  ;;  %v920_v61 = vrot.slane %v919_v53, 2  ;;  %v894_v62 = vpop.f32.mrf.mxu1  ;;  %v940_v63 = vadd.f32 %v939_v55, %v938_v49  ;;  %v1343_v48 = vpop.f32.mrf.mxu0  ;;  %v1258_v54 = vld [vmem:[%s1585_s10] ss:$0 sm:$0xff] }
 0x1ae   : > { %v932_v0 = vrot.slane %v931_v56, 4  ;;  %v952_v1 = vsel %vm452_vm2, %v900_v57, 0.0  ;;  %v895_v3 = vadd.f32 %v1246_v25, %v894_v62  ;;  %v916_v11 = vadd.f32 %v915_v58, %v914_v44 }
 0x1af   : > { %v909_v4 = vadd.f32 %v908_v59, %v907_v51  ;;  %v921_v5 = vadd.f32 %v920_v61, %v919_v53  ;;  %v941_v7 = vrot.slane %v940_v63, 2  ;;  %v953_v9 = vrot.slane %v952_v1, 4 }
 0x1b0   : > { %v933_v8 = vadd.f32 %v932_v0, %v931_v56  ;;  %v945_v10 = vsel %vm452_vm2, %v895_v3, 0.0  ;;  %v929_v12 = vrot.slane %v928_v60, 1  ;;  %v961_v24 = vmul.f32 0.125, %v916_v11 }
 0x1b1   : > { %v922_v13 = vrot.slane %v921_v5, 1  ;;  %v946_v14 = vrot.slane %v945_v10, 4  ;;  %v942_v15 = vadd.f32 %v941_v7, %v940_v63  ;;  %v954_v17 = vadd.f32 %v953_v9, %v952_v1 }
 0x1b2   : > { %v934_v16 = vrot.slane %v933_v8, 2  ;;  %v960_v18 = vmul.f32 0.125, %v909_v4  ;;  %v930_v25 = vadd.f32 %v929_v12, %v928_v60  ;;  %v1158_v58 = vstv %s1157_s19 }
 0x1b3   : > { %v923_v19 = vadd.f32 %v922_v13, %v921_v5  ;;  %v947_v20 = vadd.f32 %v946_v14, %v945_v10  ;;  %v943_v21 = vrot.slane %v942_v15, 1  ;;  %v955_v23 = vrot.slane %v954_v17, 2 }
 0x1b4   : > { %v935_v22 = vadd.f32 %v934_v16, %v933_v8  ;;  %v1052_v30 = vsel %vm1051_vm3, %v961_v24, %v960_v18  ;;  %v963_v6 = vmul.f32 0.125, %v930_v25 }
 0x1b5   : > { %v962_v26 = vmul.f32 0.125, %v923_v19  ;;  %v948_v27 = vrot.slane %v947_v20, 2  ;;  %v956_v29 = vadd.f32 %v955_v23, %v954_v17  ;;  %v944_v33 = vadd.f32 %v943_v21, %v942_v15 }
 0x1b6   : > { %v936_v28 = vrot.slane %v935_v22, 1 }
 0x1b7   : > { %v949_v31 = vadd.f32 %v948_v27, %v947_v20  ;;  %v1054_v32 = vsel %vm1053_vm4, %v962_v26, %v1052_v30  ;;  %v957_v35 = vrot.slane %v956_v29, 1  ;;  %v965_v40 = vmul.f32 0.125, %v944_v33 }
 0x1b8   : > { %v937_v34 = vadd.f32 %v936_v28, %v935_v22  ;;  %v1056_v38 = vsel %vm1055_vm5, %v963_v6, %v1054_v32 }
 0x1b9   : > { %v950_v36 = vrot.slane %v949_v31, 1  ;;  %v958_v37 = vadd.f32 %v957_v35, %v956_v29 }
 0x1ba   : > { %v964_v2 = vmul.f32 0.125, %v937_v34 }
 0x1bb   : > { %v951_v39 = vadd.f32 %v950_v36, %v949_v31  ;;  %v967_v43 = vmul.f32 0.125, %v958_v37 }
 0x1bc   : > { %v1058_v41 = vsel %vm1057_vm6, %v964_v2, %v1056_v38 }
 0x1bd   : > { %v966_v42 = vmul.f32 0.125, %v951_v39  ;;  %v1060_v44 = vsel %vm1059_vm7, %v965_v40, %v1058_v41 }
 0x1bf   : > { %v1062_v45 = vsel %vm1061_vm8, %v966_v42, %v1060_v44 }
 0x1c0   : > { %v1064_v46 = vsel %vm1063_vm9, %v967_v43, %v1062_v45 }
 0x1c1   : > { %1353 = vmatmul.mubr.msk.f32.vlgmr.msra.gmra.mxu1 %vm452_vm2, %v1064_v46 }
 0x281   : > { %v1133_v49 = vpop.f32.mrf.mxu1 }
 0x282   : > { %v1134_v51 = vadd.f32 %v1133_v49, %v1039_v47 }
 0x283   : > { %v1354_v52 = vpop.f32.mrf.mxu1 }
 0x284   : > { %v1144_v53 = vadd.f32 %v1257_v50, %v1134_v51 }
 0x286   : > { %v1145_v55 = vmax.f32 %v1144_v53, 0.0 }
 0x288   : > { %v1153_v56 = vmul.f32 %v1258_v54, %v1145_v55 }
 0x28a   : > { %v1154_v57 = vsel %vm452_vm2, %v1153_v56, 0.0 }
 0x28b   : > { %1155 = vadd.xlane.f32.xlu0 %v1154_v57 }
 0x314   : > { %v1156_v59 = vpop.xlane.xlu0 %1155 }
 0x315   : > { %v1159_v60 = vadd.f32 %v1158_v58, %v1156_v59 }
 0x317   : > { %1161 = vst.msk [vmem:[%s431_s22] sm:$0xff] %vm1160_vm10, %v1159_v60 }
 0x318 PF: > { %s23_s23 = sadd.s32 1, %s1372_s23  }
 0x319   : > { %p20_p5 = scmp.ge.s32.totalorder %s23_s23, 4  }
 0x31b   :  { %22 = sbr.rel (!%p20_p5) target bundleno = 2 (0x2), region = 101 }

</bundles_post_ra>
